<compile_context>
chip_gen: v5e
topology: v5e:2x2
jax: 0.10.0
libtpu: 0.0.40
codegen_flags: <defaults>
</compile_context>

<pallas_src>
import numpy as np

import jax
import jax.numpy as jnp
from jax.experimental import pallas as pl
from jax.experimental.pallas import tpu as pltpu

LANES = 128          # (h*w) lane axis is zero-padded up to the native width
TILE_N = 2           # samples processed per grid step (constants built for it)


def _round8(v):
    return ((v + 7) // 8) * 8


# ---------------------------------------------------------------------------
# Fused kernel: conv1 + tanh + pool1 + conv2 + tanh + pool2 + linear
# Activation layout: (rows, 128) with rows = (n, d, c) [c fastest] and
# lanes = (h, w) zero-padded from h*w up to 128.
# ---------------------------------------------------------------------------
def _net2_kernel(x_ref,
                 m1_ref, l1_ref, b1_ref, p1_ref, r1_ref,
                 m2_ref, l2_ref, b2_ref, p2_ref, r2_ref,
                 wl_ref, g_ref, bl_ref,
                 o_ref):
    f32 = jnp.float32

    def conv_tanh(x, masks, l_ref, b_ref, w):
        # 3x3x3 conv, padding=1.  (kh, kw) taps = lane roll + boundary mask;
        # kd taps + channel mixing live in the stacked folded-weight matrix,
        # applied as ONE matmul over the concatenated shifted copies.
        parts = []
        for kh in range(3):
            for kw in range(3):
                j = kh * 3 + kw
                delta = (kh - 1) * w + (kw - 1)
                s = x if delta == 0 else pltpu.roll(
                    x, shift=(-delta) % LANES, axis=1)
                parts.append(s * masks[j:j + 1, :])
        stacked = jnp.concatenate(parts, axis=0)            # (9*rows_in, 128)
        y = jnp.dot(l_ref[...], stacked, preferred_element_type=f32)
        return jnp.tanh(y + b_ref[...])

    def maxpool(y, w, p_ref, r_ref):
        # 2x2 in-plane window max: two lane rolls + VPU maxes, then one
        # compaction matmul.  Depth pair: two one-hot row selections + max.
        m = jnp.maximum(y, pltpu.roll(y, shift=LANES - 1, axis=1))
        m = jnp.maximum(m, pltpu.roll(m, shift=LANES - w, axis=1))
        mc = jnp.dot(m, p_ref[...], preferred_element_type=f32)
        return jnp.maximum(
            jnp.dot(r_ref[0], mc, preferred_element_type=f32),
            jnp.dot(r_ref[1], mc, preferred_element_type=f32))

    x0 = x_ref[...]                                          # (4T, 128)
    y1 = conv_tanh(x0, m1_ref[...], l1_ref, b1_ref, 8)       # (12T, 128)
    x1 = maxpool(y1, 8, p1_ref, r1_ref)                      # (RP1, 128)
    y2 = conv_tanh(x1, m2_ref[...], l2_ref, b2_ref, 4)       # (12T, 128)
    x2 = maxpool(y2, 4, p2_ref, r2_ref)                      # (RP2, 128)

    # Linear(24 -> 1): elementwise weights (VPU) + per-sample grouping matmul
    # + lane sum via a ones matmul (no cross-lane XLU reduce).
    t = x2 * wl_ref[...]                                     # (RP2, 128)
    v = jnp.dot(g_ref[...], t, preferred_element_type=f32)   # (T, 128)
    out = jnp.dot(v, jnp.ones((LANES, 1), f32),
                  preferred_element_type=f32) + bl_ref[...]  # (T, 1)
    o_ref[...] = out[None].astype(o_ref.dtype)               # (1, T, 1)


# ---------------------------------------------------------------------------
# One-time, batch-size-independent constant / folded-weight preparation
# ---------------------------------------------------------------------------
def prepare_constants(params, t=TILE_N):
    d0, h0, w0 = 4, 8, 8
    d1, h1, w1 = 2, 4, 4
    c1, c2 = 3, 6
    r0 = t * d0                      # conv1 input rows  (c_in = 1)
    r1 = t * d0 * c1                 # conv1 output rows
    rp1 = _round8(t * d1 * c1)       # pooled rows, stage 1 (8-row padded)
    r2 = t * d1 * c2                 # conv2 output rows
    rp2 = _round8(t * 1 * c2)        # pooled rows, stage 2 (8-row padded)

    w1_np = np.asarray(params["w1"], np.float32)
    w2_np = np.asarray(params["w2"], np.float32)

    # --- boundary masks for the (kh, kw) lane rolls (padding=1 semantics) ---
    def conv_mask(h, w):
        m = np.zeros((9, LANES), np.float32)
        for kh in range(3):
            for kw in range(3):
                j = kh * 3 + kw
                for ho in range(h):
                    for wo in range(w):
                        if 0 <= ho + kh - 1 < h and 0 <= wo + kw - 1 < w:
                            m[j, ho * w + wo] = 1.0
        return m

    mask1 = conv_mask(h0, w0)
    mask2 = conv_mask(h1, w1)

    # --- folded conv weights, stacked over the 9 (kh, kw) taps -------------
    l1 = np.zeros((r1, 9 * r0), np.float32)
    for kh in range(3):
        for kw in range(3):
            j = kh * 3 + kw
            for n in range(t):
                for do in range(d0):
                    for di in range(d0):
                        kd = di - do + 1
                        if 0 <= kd < 3:
                            for co in range(c1):
                                l1[(n * d0 + do) * c1 + co,
                                   j * r0 + n * d0 + di] = w1_np[co, 0, kd, kh, kw]

    l2 = np.zeros((r2, 9 * rp1), np.float32)
    for kh in range(3):
        for kw in range(3):
            j = kh * 3 + kw
            for n in range(t):
                for do in range(d1):
                    for di in range(d1):
                        kd = di - do + 1
                        if 0 <= kd < 3:
                            for co in range(c2):
                                for ci in range(c1):
                                    l2[(n * d1 + do) * c2 + co,
                                       j * rp1 + (n * d1 + di) * c1 + ci] = \
                                        w2_np[co, ci, kd, kh, kw]

    bias1 = np.tile(np.asarray(params["b1"], np.float32), t * d0).reshape(r1, 1)
    bias2 = np.tile(np.asarray(params["b2"], np.float32), t * d1).reshape(r2, 1)

    # --- lane compaction matrices (pick top-left lane of each 2x2 window) --
    def compaction(h, w):
        p = np.zeros((LANES, LANES), np.float32)
        for hp in range(h // 2):
            for wp in range(w // 2):
                p[(2 * hp) * w + 2 * wp, hp * (w // 2) + wp] = 1.0
        return p

    p1 = compaction(h0, w0)
    p2 = compaction(h1, w1)

    # --- depth-pair one-hot row selections ----------------------------------
    rsel1 = np.zeros((2, rp1, r1), np.float32)
    for s in range(2):
        for n in range(t):
            for dp in range(d0 // 2):
                for c in range(c1):
                    rsel1[s, (n * (d0 // 2) + dp) * c1 + c,
                          (n * d0 + 2 * dp + s) * c1 + c] = 1.0

    rsel2 = np.zeros((2, rp2, r2), np.float32)
    for s in range(2):
        for n in range(t):
            for c in range(c2):
                rsel2[s, n * c2 + c, (n * d1 + s) * c2 + c] = 1.0

    # --- linear (PyTorch flatten order (C, D=1, H, W) -> f = c*4 + h*2 + w) -
    wl_np = np.asarray(params["wl"], np.float32).reshape(c2, 4)
    wlm = np.zeros((rp2, LANES), np.float32)
    for n in range(t):
        wlm[n * c2:(n + 1) * c2, 0:4] = wl_np
    g = np.zeros((t, rp2), np.float32)
    for n in range(t):
        g[n, n * c2:(n + 1) * c2] = 1.0
    blc = np.full((t, 1), float(np.asarray(params["bl"])[0]), np.float32)

    return tuple(jnp.asarray(a) for a in
                 (mask1, l1, bias1, p1, rsel1,
                  mask2, l2, bias2, p2, rsel2,
                  wlm, g, blc))


# ---------------------------------------------------------------------------
# Forward pass: one reshape/pad + one gridded pallas_call over batch tiles
# ---------------------------------------------------------------------------
def net2_forward(prep, x, tile_n=TILE_N):
    n = x.shape[0]
    assert x.shape[1:] == (1, 4, 8, 8)
    n_pad = ((n + tile_n - 1) // tile_n) * tile_n
    num_tiles = n_pad // tile_n

    x0 = x.reshape(n * 4, 64).astype(jnp.float32)            # rows=(n,d), lanes=(h,w)
    x0 = jnp.pad(x0, ((0, (n_pad - n) * 4), (0, LANES - 64)))

    def const_spec(arr):
        nd = arr.ndim
        return pl.BlockSpec(arr.shape, lambda i, _nd=nd: (0,) * _nd)

    in_specs = [pl.BlockSpec((4 * tile_n, LANES), lambda i: (i, 0))]
    in_specs += [const_spec(a) for a in prep]

    out = pl.pallas_call(
        _net2_kernel,
        grid=(num_tiles,),
        out_shape=jax.ShapeDtypeStruct((num_tiles, tile_n, 1), jnp.float32),
        in_specs=in_specs,
        out_specs=pl.BlockSpec((1, tile_n, 1), lambda i: (i, 0, 0)),
        compiler_params=pltpu.CompilerParams(
            dimension_semantics=("parallel",),
            vmem_limit_bytes=16 * 1024 * 1024),
    )(x0, *prep)
    return out.reshape(n_pad, 1)[:n]


# ---------------------------------------------------------------------------
# Parameters (mimic PyTorch default U(-1/sqrt(fan_in), +1/sqrt(fan_in)))
# ---------------------------------------------------------------------------
def init_params(key):
    ks = jax.random.split(key, 6)

    def u(k, shape, fan_in):
        bound = 1.0 / float(fan_in) ** 0.5
        return jax.random.uniform(k, shape, jnp.float32, -bound, bound)

    return {
        "w1": u(ks[0], (3, 1, 3, 3, 3), 1 * 27),
        "b1": u(ks[1], (3,), 1 * 27),
        "w2": u(ks[2], (6, 3, 3, 3, 3), 3 * 27),
        "b2": u(ks[3], (6,), 3 * 27),
        "wl": u(ks[4], (1, 24), 24),
        "bl": u(ks[5], (1,), 24),
    }


# ---------------------------------------------------------------------------
# Plain-JAX reference (HIGHEST precision) for the numerical check
# ---------------------------------------------------------------------------
def _conv3d_ref(x, w, b):
    dn = jax.lax.conv_dimension_numbers(x.shape, w.shape,
                                        ("NCDHW", "OIDHW", "NCDHW"))
    y = jax.lax.conv_general_dilated(x, w, window_strides=(1, 1, 1),
                                     padding=((1, 1), (1, 1), (1, 1)),
                                     dimension_numbers=dn,
                                     precision=jax.lax.Precision.HIGHEST)
    return y + b.reshape(1, -1, 1, 1, 1)


def net2_reference(params, x):
    y = jnp.tanh(_conv3d_ref(x, params["w1"], params["b1"]))
    y = jax.lax.reduce_window(y, -jnp.inf, jax.lax.max,
                              (1, 1, 2, 2, 2), (1, 1, 2, 2, 2), "VALID")
    y = jnp.tanh(_conv3d_ref(y, params["w2"], params["b2"]))
    y = jax.lax.reduce_window(y, -jnp.inf, jax.lax.max,
                              (1, 1, 2, 2, 2), (1, 1, 2, 2, 2), "VALID")
    y = y.reshape(y.shape[0], -1)
    return jnp.dot(y, params["wl"].T,
                   precision=jax.lax.Precision.HIGHEST) + params["bl"]


if __name__ == "__main__":
    key = jax.random.PRNGKey(0)
    kx, kp = jax.random.split(key)
    # (D, H, W) = (4, 8, 8) is implied by Linear(6*1*2*2, 1) after two pools.
    x = jax.random.normal(kx, (4, 1, 4, 8, 8), dtype=jnp.float32)
    params = init_params(kp)

    prep = prepare_constants(params)          # one-time, batch-independent
    fwd = jax.jit(net2_forward)

    out = fwd(prep, x)
    jax.block_until_ready(out)

    assert out.shape == (x.shape[0], 1) and out.dtype == jnp.float32
    ref = net2_reference(params, x)
    err = float(jnp.max(jnp.abs(out - ref)))
    # Exact f32 reformulation; 5e-3 (vs 2e-2 before) leaves margin only for
    # MXU pass-precision differences on f32 dot operands across TPU gens.
    assert err < 5e-3, f"mismatch vs reference: {err}"
    print("KERNEL_OK")
</pallas_src>

<mosaic_0001>
module attributes {stable_mosaic.version = 11 : i64} {
  func.func @_net2_kernel(%arg0: i32, %arg1: memref<8x128xf32, #tpu.memory_space<vmem>>, %arg2: memref<9x128xf32, #tpu.memory_space<vmem>>, %arg3: memref<24x72xf32, #tpu.memory_space<vmem>>, %arg4: memref<24x1xf32, #tpu.memory_space<vmem>>, %arg5: memref<128x128xf32, #tpu.memory_space<vmem>>, %arg6: memref<2x16x24xf32, #tpu.memory_space<vmem>>, %arg7: memref<9x128xf32, #tpu.memory_space<vmem>>, %arg8: memref<24x144xf32, #tpu.memory_space<vmem>>, %arg9: memref<24x1xf32, #tpu.memory_space<vmem>>, %arg10: memref<128x128xf32, #tpu.memory_space<vmem>>, %arg11: memref<2x16x24xf32, #tpu.memory_space<vmem>>, %arg12: memref<16x128xf32, #tpu.memory_space<vmem>>, %arg13: memref<2x16xf32, #tpu.memory_space<vmem>>, %arg14: memref<2x1xf32, #tpu.memory_space<vmem>>, %arg15: memref<1x2x1xf32, #tpu.memory_space<vmem>>) attributes {dimension_semantics = [#tpu.dimension_semantics<parallel>], iteration_bounds = array<i64: 2>, scalar_prefetch = 0 : i64, scratch_operands = 0 : i64, tpu.core_type = #tpu.core_type<tc>, window_params = [{transform_indices = @transform_0, window_bounds = array<i64: 8, 128>}, {pipeline_mode = #tpu.pipeline_mode<synchronous>, transform_indices = @transform_1, window_bounds = array<i64: 9, 128>}, {pipeline_mode = #tpu.pipeline_mode<synchronous>, transform_indices = @transform_2, window_bounds = array<i64: 24, 72>}, {pipeline_mode = #tpu.pipeline_mode<synchronous>, transform_indices = @transform_3, window_bounds = array<i64: 24, 1>}, {pipeline_mode = #tpu.pipeline_mode<synchronous>, transform_indices = @transform_4, window_bounds = array<i64: 128, 128>}, {pipeline_mode = #tpu.pipeline_mode<synchronous>, transform_indices = @transform_5, window_bounds = array<i64: 2, 16, 24>}, {pipeline_mode = #tpu.pipeline_mode<synchronous>, transform_indices = @transform_6, window_bounds = array<i64: 9, 128>}, {pipeline_mode = #tpu.pipeline_mode<synchronous>, transform_indices = @transform_7, window_bounds = array<i64: 24, 144>}, {pipeline_mode = #tpu.pipeline_mode<synchronous>, transform_indices = @transform_8, window_bounds = array<i64: 24, 1>}, {pipeline_mode = #tpu.pipeline_mode<synchronous>, transform_indices = @transform_9, window_bounds = array<i64: 128, 128>}, {pipeline_mode = #tpu.pipeline_mode<synchronous>, transform_indices = @transform_10, window_bounds = array<i64: 2, 16, 24>}, {pipeline_mode = #tpu.pipeline_mode<synchronous>, transform_indices = @transform_11, window_bounds = array<i64: 16, 128>}, {pipeline_mode = #tpu.pipeline_mode<synchronous>, transform_indices = @transform_12, window_bounds = array<i64: 2, 16>}, {pipeline_mode = #tpu.pipeline_mode<synchronous>, transform_indices = @transform_13, window_bounds = array<i64: 2, 1>}, {transform_indices = @transform_14, window_bounds = array<i64: 1, 2, 1>}]} {
    %c0 = arith.constant 0 : index
    %c0_0 = arith.constant 0 : index
    %0 = vector.load %arg1[%c0, %c0_0] : memref<8x128xf32, #tpu.memory_space<vmem>>, vector<8x128xf32>
    %c0_1 = arith.constant 0 : index
    %c0_2 = arith.constant 0 : index
    %1 = vector.load %arg2[%c0_1, %c0_2] : memref<9x128xf32, #tpu.memory_space<vmem>>, vector<9x128xf32>
    %c9_i32 = arith.constant 9 : i32
    %2 = tpu.dynamic_rotate %0 by %c9_i32 dim 1 : vector<8x128xf32>, i32 -> vector<8x128xf32>
    %3 = vector.extract_strided_slice %1 {offsets = [0, 0], sizes = [1, 128], strides = [1, 1]} : vector<9x128xf32> to vector<1x128xf32>
    %4 = vector.broadcast %3 : vector<1x128xf32> to vector<8x128xf32>
    %5 = arith.mulf %2, %4 : vector<8x128xf32>
    %c8_i32 = arith.constant 8 : i32
    %6 = tpu.dynamic_rotate %0 by %c8_i32 dim 1 : vector<8x128xf32>, i32 -> vector<8x128xf32>
    %7 = vector.extract_strided_slice %1 {offsets = [1, 0], sizes = [1, 128], strides = [1, 1]} : vector<9x128xf32> to vector<1x128xf32>
    %8 = vector.broadcast %7 : vector<1x128xf32> to vector<8x128xf32>
    %9 = arith.mulf %6, %8 : vector<8x128xf32>
    %c7_i32 = arith.constant 7 : i32
    %10 = tpu.dynamic_rotate %0 by %c7_i32 dim 1 : vector<8x128xf32>, i32 -> vector<8x128xf32>
    %11 = vector.extract_strided_slice %1 {offsets = [2, 0], sizes = [1, 128], strides = [1, 1]} : vector<9x128xf32> to vector<1x128xf32>
    %12 = vector.broadcast %11 : vector<1x128xf32> to vector<8x128xf32>
    %13 = arith.mulf %10, %12 : vector<8x128xf32>
    %c1_i32 = arith.constant 1 : i32
    %14 = tpu.dynamic_rotate %0 by %c1_i32 dim 1 : vector<8x128xf32>, i32 -> vector<8x128xf32>
    %15 = vector.extract_strided_slice %1 {offsets = [3, 0], sizes = [1, 128], strides = [1, 1]} : vector<9x128xf32> to vector<1x128xf32>
    %16 = vector.broadcast %15 : vector<1x128xf32> to vector<8x128xf32>
    %17 = arith.mulf %14, %16 : vector<8x128xf32>
    %18 = vector.extract_strided_slice %1 {offsets = [4, 0], sizes = [1, 128], strides = [1, 1]} : vector<9x128xf32> to vector<1x128xf32>
    %19 = vector.broadcast %18 : vector<1x128xf32> to vector<8x128xf32>
    %20 = arith.mulf %0, %19 : vector<8x128xf32>
    %c127_i32 = arith.constant 127 : i32
    %21 = tpu.dynamic_rotate %0 by %c127_i32 dim 1 : vector<8x128xf32>, i32 -> vector<8x128xf32>
    %22 = vector.extract_strided_slice %1 {offsets = [5, 0], sizes = [1, 128], strides = [1, 1]} : vector<9x128xf32> to vector<1x128xf32>
    %23 = vector.broadcast %22 : vector<1x128xf32> to vector<8x128xf32>
    %24 = arith.mulf %21, %23 : vector<8x128xf32>
    %c121_i32 = arith.constant 121 : i32
    %25 = tpu.dynamic_rotate %0 by %c121_i32 dim 1 : vector<8x128xf32>, i32 -> vector<8x128xf32>
    %26 = vector.extract_strided_slice %1 {offsets = [6, 0], sizes = [1, 128], strides = [1, 1]} : vector<9x128xf32> to vector<1x128xf32>
    %27 = vector.broadcast %26 : vector<1x128xf32> to vector<8x128xf32>
    %28 = arith.mulf %25, %27 : vector<8x128xf32>
    %c120_i32 = arith.constant 120 : i32
    %29 = tpu.dynamic_rotate %0 by %c120_i32 dim 1 : vector<8x128xf32>, i32 -> vector<8x128xf32>
    %30 = vector.extract_strided_slice %1 {offsets = [7, 0], sizes = [1, 128], strides = [1, 1]} : vector<9x128xf32> to vector<1x128xf32>
    %31 = vector.broadcast %30 : vector<1x128xf32> to vector<8x128xf32>
    %32 = arith.mulf %29, %31 : vector<8x128xf32>
    %c119_i32 = arith.constant 119 : i32
    %33 = tpu.dynamic_rotate %0 by %c119_i32 dim 1 : vector<8x128xf32>, i32 -> vector<8x128xf32>
    %34 = vector.extract_strided_slice %1 {offsets = [8, 0], sizes = [1, 128], strides = [1, 1]} : vector<9x128xf32> to vector<1x128xf32>
    %35 = vector.broadcast %34 : vector<1x128xf32> to vector<8x128xf32>
    %36 = arith.mulf %33, %35 : vector<8x128xf32>
    %37 = tpu.concatenate %5, %9, %13, %17, %20, %24, %28, %32, %36 in 0 : vector<8x128xf32>, vector<8x128xf32>, vector<8x128xf32>, vector<8x128xf32>, vector<8x128xf32>, vector<8x128xf32>, vector<8x128xf32>, vector<8x128xf32>, vector<8x128xf32> -> vector<72x128xf32>
    %c0_3 = arith.constant 0 : index
    %c0_4 = arith.constant 0 : index
    %38 = vector.load %arg3[%c0_3, %c0_4] : memref<24x72xf32, #tpu.memory_space<vmem>>, vector<24x72xf32>
    %cst = arith.constant dense<0.000000e+00> : vector<24x128xf32>
    %39 = tpu.matmul %38, %37, %cst {dimension_numbers = #tpu.dot_dimension_numbers<[1], [0], [0], [1], [0, 0, 1, 1], [], []>} : vector<24x72xf32>, vector<72x128xf32>, vector<24x128xf32> -> vector<24x128xf32>
    %c0_5 = arith.constant 0 : index
    %c0_6 = arith.constant 0 : index
    %40 = vector.load %arg4[%c0_5, %c0_6] : memref<24x1xf32, #tpu.memory_space<vmem>>, vector<24x1xf32>
    %41 = vector.broadcast %40 : vector<24x1xf32> to vector<24x128xf32>
    %42 = arith.addf %39, %41 : vector<24x128xf32>
    %43 = math.tanh %42 : vector<24x128xf32>
    %c127_i32_7 = arith.constant 127 : i32
    %44 = tpu.dynamic_rotate %43 by %c127_i32_7 dim 1 : vector<24x128xf32>, i32 -> vector<24x128xf32>
    %45 = arith.maximumf %43, %44 : vector<24x128xf32>
    %c120_i32_8 = arith.constant 120 : i32
    %46 = tpu.dynamic_rotate %45 by %c120_i32_8 dim 1 : vector<24x128xf32>, i32 -> vector<24x128xf32>
    %47 = arith.maximumf %45, %46 : vector<24x128xf32>
    %c0_9 = arith.constant 0 : index
    %c0_10 = arith.constant 0 : index
    %48 = vector.load %arg5[%c0_9, %c0_10] : memref<128x128xf32, #tpu.memory_space<vmem>>, vector<128x128xf32>
    %cst_11 = arith.constant dense<0.000000e+00> : vector<24x128xf32>
    %49 = tpu.matmul %47, %48, %cst_11 {dimension_numbers = #tpu.dot_dimension_numbers<[1], [0], [0], [1], [0, 0, 1, 1], [], []>} : vector<24x128xf32>, vector<128x128xf32>, vector<24x128xf32> -> vector<24x128xf32>
    %c0_12 = arith.constant 0 : index
    %c0_13 = arith.constant 0 : index
    %c0_14 = arith.constant 0 : index
    %50 = vector.load %arg6[%c0_12, %c0_13, %c0_14] : memref<2x16x24xf32, #tpu.memory_space<vmem>>, vector<1x16x24xf32>
    %51 = vector.shape_cast %50 : vector<1x16x24xf32> to vector<16x24xf32>
    %cst_15 = arith.constant dense<0.000000e+00> : vector<16x128xf32>
    %52 = tpu.matmul %51, %49, %cst_15 {dimension_numbers = #tpu.dot_dimension_numbers<[1], [0], [0], [1], [0, 0, 1, 1], [], []>} : vector<16x24xf32>, vector<24x128xf32>, vector<16x128xf32> -> vector<16x128xf32>
    %c1 = arith.constant 1 : index
    %c0_16 = arith.constant 0 : index
    %c0_17 = arith.constant 0 : index
    %53 = vector.load %arg6[%c1, %c0_16, %c0_17] : memref<2x16x24xf32, #tpu.memory_space<vmem>>, vector<1x16x24xf32>
    %54 = vector.shape_cast %53 : vector<1x16x24xf32> to vector<16x24xf32>
    %cst_18 = arith.constant dense<0.000000e+00> : vector<16x128xf32>
    %55 = tpu.matmul %54, %49, %cst_18 {dimension_numbers = #tpu.dot_dimension_numbers<[1], [0], [0], [1], [0, 0, 1, 1], [], []>} : vector<16x24xf32>, vector<24x128xf32>, vector<16x128xf32> -> vector<16x128xf32>
    %56 = arith.maximumf %52, %55 : vector<16x128xf32>
    %c0_19 = arith.constant 0 : index
    %c0_20 = arith.constant 0 : index
    %57 = vector.load %arg7[%c0_19, %c0_20] : memref<9x128xf32, #tpu.memory_space<vmem>>, vector<9x128xf32>
    %c5_i32 = arith.constant 5 : i32
    %58 = tpu.dynamic_rotate %56 by %c5_i32 dim 1 : vector<16x128xf32>, i32 -> vector<16x128xf32>
    %59 = vector.extract_strided_slice %57 {offsets = [0, 0], sizes = [1, 128], strides = [1, 1]} : vector<9x128xf32> to vector<1x128xf32>
    %60 = vector.broadcast %59 : vector<1x128xf32> to vector<16x128xf32>
    %61 = arith.mulf %58, %60 : vector<16x128xf32>
    %c4_i32 = arith.constant 4 : i32
    %62 = tpu.dynamic_rotate %56 by %c4_i32 dim 1 : vector<16x128xf32>, i32 -> vector<16x128xf32>
    %63 = vector.extract_strided_slice %57 {offsets = [1, 0], sizes = [1, 128], strides = [1, 1]} : vector<9x128xf32> to vector<1x128xf32>
    %64 = vector.broadcast %63 : vector<1x128xf32> to vector<16x128xf32>
    %65 = arith.mulf %62, %64 : vector<16x128xf32>
    %c3_i32 = arith.constant 3 : i32
    %66 = tpu.dynamic_rotate %56 by %c3_i32 dim 1 : vector<16x128xf32>, i32 -> vector<16x128xf32>
    %67 = vector.extract_strided_slice %57 {offsets = [2, 0], sizes = [1, 128], strides = [1, 1]} : vector<9x128xf32> to vector<1x128xf32>
    %68 = vector.broadcast %67 : vector<1x128xf32> to vector<16x128xf32>
    %69 = arith.mulf %66, %68 : vector<16x128xf32>
    %c1_i32_21 = arith.constant 1 : i32
    %70 = tpu.dynamic_rotate %56 by %c1_i32_21 dim 1 : vector<16x128xf32>, i32 -> vector<16x128xf32>
    %71 = vector.extract_strided_slice %57 {offsets = [3, 0], sizes = [1, 128], strides = [1, 1]} : vector<9x128xf32> to vector<1x128xf32>
    %72 = vector.broadcast %71 : vector<1x128xf32> to vector<16x128xf32>
    %73 = arith.mulf %70, %72 : vector<16x128xf32>
    %74 = vector.extract_strided_slice %57 {offsets = [4, 0], sizes = [1, 128], strides = [1, 1]} : vector<9x128xf32> to vector<1x128xf32>
    %75 = vector.broadcast %74 : vector<1x128xf32> to vector<16x128xf32>
    %76 = arith.mulf %56, %75 : vector<16x128xf32>
    %c127_i32_22 = arith.constant 127 : i32
    %77 = tpu.dynamic_rotate %56 by %c127_i32_22 dim 1 : vector<16x128xf32>, i32 -> vector<16x128xf32>
    %78 = vector.extract_strided_slice %57 {offsets = [5, 0], sizes = [1, 128], strides = [1, 1]} : vector<9x128xf32> to vector<1x128xf32>
    %79 = vector.broadcast %78 : vector<1x128xf32> to vector<16x128xf32>
    %80 = arith.mulf %77, %79 : vector<16x128xf32>
    %c125_i32 = arith.constant 125 : i32
    %81 = tpu.dynamic_rotate %56 by %c125_i32 dim 1 : vector<16x128xf32>, i32 -> vector<16x128xf32>
    %82 = vector.extract_strided_slice %57 {offsets = [6, 0], sizes = [1, 128], strides = [1, 1]} : vector<9x128xf32> to vector<1x128xf32>
    %83 = vector.broadcast %82 : vector<1x128xf32> to vector<16x128xf32>
    %84 = arith.mulf %81, %83 : vector<16x128xf32>
    %c124_i32 = arith.constant 124 : i32
    %85 = tpu.dynamic_rotate %56 by %c124_i32 dim 1 : vector<16x128xf32>, i32 -> vector<16x128xf32>
    %86 = vector.extract_strided_slice %57 {offsets = [7, 0], sizes = [1, 128], strides = [1, 1]} : vector<9x128xf32> to vector<1x128xf32>
    %87 = vector.broadcast %86 : vector<1x128xf32> to vector<16x128xf32>
    %88 = arith.mulf %85, %87 : vector<16x128xf32>
    %c123_i32 = arith.constant 123 : i32
    %89 = tpu.dynamic_rotate %56 by %c123_i32 dim 1 : vector<16x128xf32>, i32 -> vector<16x128xf32>
    %90 = vector.extract_strided_slice %57 {offsets = [8, 0], sizes = [1, 128], strides = [1, 1]} : vector<9x128xf32> to vector<1x128xf32>
    %91 = vector.broadcast %90 : vector<1x128xf32> to vector<16x128xf32>
    %92 = arith.mulf %89, %91 : vector<16x128xf32>
    %93 = tpu.concatenate %61, %65, %69, %73, %76, %80, %84, %88, %92 in 0 : vector<16x128xf32>, vector<16x128xf32>, vector<16x128xf32>, vector<16x128xf32>, vector<16x128xf32>, vector<16x128xf32>, vector<16x128xf32>, vector<16x128xf32>, vector<16x128xf32> -> vector<144x128xf32>
    %c0_23 = arith.constant 0 : index
    %c0_24 = arith.constant 0 : index
    %94 = vector.load %arg8[%c0_23, %c0_24] : memref<24x144xf32, #tpu.memory_space<vmem>>, vector<24x144xf32>
    %cst_25 = arith.constant dense<0.000000e+00> : vector<24x128xf32>
    %95 = tpu.matmul %94, %93, %cst_25 {dimension_numbers = #tpu.dot_dimension_numbers<[1], [0], [0], [1], [0, 0, 1, 1], [], []>} : vector<24x144xf32>, vector<144x128xf32>, vector<24x128xf32> -> vector<24x128xf32>
    %c0_26 = arith.constant 0 : index
    %c0_27 = arith.constant 0 : index
    %96 = vector.load %arg9[%c0_26, %c0_27] : memref<24x1xf32, #tpu.memory_space<vmem>>, vector<24x1xf32>
    %97 = vector.broadcast %96 : vector<24x1xf32> to vector<24x128xf32>
    %98 = arith.addf %95, %97 : vector<24x128xf32>
    %99 = math.tanh %98 : vector<24x128xf32>
    %c127_i32_28 = arith.constant 127 : i32
    %100 = tpu.dynamic_rotate %99 by %c127_i32_28 dim 1 : vector<24x128xf32>, i32 -> vector<24x128xf32>
    %101 = arith.maximumf %99, %100 : vector<24x128xf32>
    %c124_i32_29 = arith.constant 124 : i32
    %102 = tpu.dynamic_rotate %101 by %c124_i32_29 dim 1 : vector<24x128xf32>, i32 -> vector<24x128xf32>
    %103 = arith.maximumf %101, %102 : vector<24x128xf32>
    %c0_30 = arith.constant 0 : index
    %c0_31 = arith.constant 0 : index
    %104 = vector.load %arg10[%c0_30, %c0_31] : memref<128x128xf32, #tpu.memory_space<vmem>>, vector<128x128xf32>
    %cst_32 = arith.constant dense<0.000000e+00> : vector<24x128xf32>
    %105 = tpu.matmul %103, %104, %cst_32 {dimension_numbers = #tpu.dot_dimension_numbers<[1], [0], [0], [1], [0, 0, 1, 1], [], []>} : vector<24x128xf32>, vector<128x128xf32>, vector<24x128xf32> -> vector<24x128xf32>
    %c0_33 = arith.constant 0 : index
    %c0_34 = arith.constant 0 : index
    %c0_35 = arith.constant 0 : index
    %106 = vector.load %arg11[%c0_33, %c0_34, %c0_35] : memref<2x16x24xf32, #tpu.memory_space<vmem>>, vector<1x16x24xf32>
    %107 = vector.shape_cast %106 : vector<1x16x24xf32> to vector<16x24xf32>
    %cst_36 = arith.constant dense<0.000000e+00> : vector<16x128xf32>
    %108 = tpu.matmul %107, %105, %cst_36 {dimension_numbers = #tpu.dot_dimension_numbers<[1], [0], [0], [1], [0, 0, 1, 1], [], []>} : vector<16x24xf32>, vector<24x128xf32>, vector<16x128xf32> -> vector<16x128xf32>
    %c1_37 = arith.constant 1 : index
    %c0_38 = arith.constant 0 : index
    %c0_39 = arith.constant 0 : index
    %109 = vector.load %arg11[%c1_37, %c0_38, %c0_39] : memref<2x16x24xf32, #tpu.memory_space<vmem>>, vector<1x16x24xf32>
    %110 = vector.shape_cast %109 : vector<1x16x24xf32> to vector<16x24xf32>
    %cst_40 = arith.constant dense<0.000000e+00> : vector<16x128xf32>
    %111 = tpu.matmul %110, %105, %cst_40 {dimension_numbers = #tpu.dot_dimension_numbers<[1], [0], [0], [1], [0, 0, 1, 1], [], []>} : vector<16x24xf32>, vector<24x128xf32>, vector<16x128xf32> -> vector<16x128xf32>
    %112 = arith.maximumf %108, %111 : vector<16x128xf32>
    %c0_41 = arith.constant 0 : index
    %c0_42 = arith.constant 0 : index
    %113 = vector.load %arg12[%c0_41, %c0_42] : memref<16x128xf32, #tpu.memory_space<vmem>>, vector<16x128xf32>
    %114 = arith.mulf %112, %113 : vector<16x128xf32>
    %c0_43 = arith.constant 0 : index
    %c0_44 = arith.constant 0 : index
    %115 = vector.load %arg13[%c0_43, %c0_44] : memref<2x16xf32, #tpu.memory_space<vmem>>, vector<2x16xf32>
    %cst_45 = arith.constant dense<0.000000e+00> : vector<2x128xf32>
    %116 = tpu.matmul %115, %114, %cst_45 {dimension_numbers = #tpu.dot_dimension_numbers<[1], [0], [0], [1], [0, 0, 1, 1], [], []>} : vector<2x16xf32>, vector<16x128xf32>, vector<2x128xf32> -> vector<2x128xf32>
    %cst_46 = arith.constant 1.000000e+00 : f32
    %117 = vector.broadcast %cst_46 : f32 to vector<128x1xf32>
    %cst_47 = arith.constant dense<0.000000e+00> : vector<2x1xf32>
    %118 = tpu.matmul %116, %117, %cst_47 {dimension_numbers = #tpu.dot_dimension_numbers<[1], [0], [0], [1], [0, 0, 1, 1], [], []>} : vector<2x128xf32>, vector<128x1xf32>, vector<2x1xf32> -> vector<2x1xf32>
    %c0_48 = arith.constant 0 : index
    %c0_49 = arith.constant 0 : index
    %119 = vector.load %arg14[%c0_48, %c0_49] : memref<2x1xf32, #tpu.memory_space<vmem>>, vector<2x1xf32>
    %120 = arith.addf %118, %119 : vector<2x1xf32>
    %121 = vector.shape_cast %120 : vector<2x1xf32> to vector<1x2x1xf32>
    %c0_50 = arith.constant 0 : index
    %c0_51 = arith.constant 0 : index
    %c0_52 = arith.constant 0 : index
    %122 = vector.load %arg15[%c0_50, %c0_51, %c0_52] : memref<1x2x1xf32, #tpu.memory_space<vmem>>, vector<1x2x1xf32>
    tpu.vector_store %arg15[%c0_50, %c0_51, %c0_52], %121 {strides = array<i32>} : memref<1x2x1xf32, #tpu.memory_space<vmem>>, vector<1x2x1xf32>,
    return
  }
  func.func @transform_0(%arg0: i32) -> (i32, i32) {
    %c0_i32 = arith.constant 0 : i32
    %c0_i32_0 = arith.constant 0 : i32
    return %arg0, %c0_i32 : i32, i32
  }
  func.func @transform_1(%arg0: i32) -> (i32, i32) {
    %c0_i32 = arith.constant 0 : i32
    %c0_i32_0 = arith.constant 0 : i32
    %c0_i32_1 = arith.constant 0 : i32
    return %c0_i32, %c0_i32_0 : i32, i32
  }
  func.func @transform_2(%arg0: i32) -> (i32, i32) {
    %c0_i32 = arith.constant 0 : i32
    %c0_i32_0 = arith.constant 0 : i32
    %c0_i32_1 = arith.constant 0 : i32
    return %c0_i32, %c0_i32_0 : i32, i32
  }
  func.func @transform_3(%arg0: i32) -> (i32, i32) {
    %c0_i32 = arith.constant 0 : i32
    %c0_i32_0 = arith.constant 0 : i32
    %c0_i32_1 = arith.constant 0 : i32
    return %c0_i32, %c0_i32_0 : i32, i32
  }
  func.func @transform_4(%arg0: i32) -> (i32, i32) {
    %c0_i32 = arith.constant 0 : i32
    %c0_i32_0 = arith.constant 0 : i32
    %c0_i32_1 = arith.constant 0 : i32
    return %c0_i32, %c0_i32_0 : i32, i32
  }
  func.func @transform_5(%arg0: i32) -> (i32, i32, i32) {
    %c0_i32 = arith.constant 0 : i32
    %c0_i32_0 = arith.constant 0 : i32
    %c0_i32_1 = arith.constant 0 : i32
    %c0_i32_2 = arith.constant 0 : i32
    return %c0_i32, %c0_i32_0, %c0_i32_1 : i32, i32, i32
  }
  func.func @transform_6(%arg0: i32) -> (i32, i32) {
    %c0_i32 = arith.constant 0 : i32
    %c0_i32_0 = arith.constant 0 : i32
    %c0_i32_1 = arith.constant 0 : i32
    return %c0_i32, %c0_i32_0 : i32, i32
  }
  func.func @transform_7(%arg0: i32) -> (i32, i32) {
    %c0_i32 = arith.constant 0 : i32
    %c0_i32_0 = arith.constant 0 : i32
    %c0_i32_1 = arith.constant 0 : i32
    return %c0_i32, %c0_i32_0 : i32, i32
  }
  func.func @transform_8(%arg0: i32) -> (i32, i32) {
    %c0_i32 = arith.constant 0 : i32
    %c0_i32_0 = arith.constant 0 : i32
    %c0_i32_1 = arith.constant 0 : i32
    return %c0_i32, %c0_i32_0 : i32, i32
  }
  func.func @transform_9(%arg0: i32) -> (i32, i32) {
    %c0_i32 = arith.constant 0 : i32
    %c0_i32_0 = arith.constant 0 : i32
    %c0_i32_1 = arith.constant 0 : i32
    return %c0_i32, %c0_i32_0 : i32, i32
  }
  func.func @transform_10(%arg0: i32) -> (i32, i32, i32) {
    %c0_i32 = arith.constant 0 : i32
    %c0_i32_0 = arith.constant 0 : i32
    %c0_i32_1 = arith.constant 0 : i32
    %c0_i32_2 = arith.constant 0 : i32
    return %c0_i32, %c0_i32_0, %c0_i32_1 : i32, i32, i32
  }
  func.func @transform_11(%arg0: i32) -> (i32, i32) {
    %c0_i32 = arith.constant 0 : i32
    %c0_i32_0 = arith.constant 0 : i32
    %c0_i32_1 = arith.constant 0 : i32
    return %c0_i32, %c0_i32_0 : i32, i32
  }
  func.func @transform_12(%arg0: i32) -> (i32, i32) {
    %c0_i32 = arith.constant 0 : i32
    %c0_i32_0 = arith.constant 0 : i32
    %c0_i32_1 = arith.constant 0 : i32
    return %c0_i32, %c0_i32_0 : i32, i32
  }
  func.func @transform_13(%arg0: i32) -> (i32, i32) {
    %c0_i32 = arith.constant 0 : i32
    %c0_i32_0 = arith.constant 0 : i32
    %c0_i32_1 = arith.constant 0 : i32
    return %c0_i32, %c0_i32_0 : i32, i32
  }
  func.func @transform_14(%arg0: i32) -> (i32, i32, i32) {
    %c0_i32 = arith.constant 0 : i32
    %c0_i32_0 = arith.constant 0 : i32
    %c0_i32_1 = arith.constant 0 : i32
    return %arg0, %c0_i32, %c0_i32_0 : i32, i32, i32
  }
}

</mosaic_0001>

<bundles_post_ra>
// kernel: net2_forward.1
= control target key start
LH: loop header
LB: loop body
LE: loop exit
PB: predicated region body
PF: predicated region fallthrough
CT: control target
= control target key end

     0   :  { %s1827_s0 = inlined_call_operand.vmem [shape: f32[16,128], index: 0, kind: input, shape index: {}]   ;;  %s1828_s1 = inlined_call_operand.vmem [shape: f32[9,128], index: 1, kind: input, shape index: {}]   ;;  %s1829_s2 = inlined_call_operand.hbm [shape: f32[24,72], index: 2, kind: input, shape index: {}]   ;;  %s1830_s3 = inlined_call_operand.vmem [shape: f32[24,1], index: 3, kind: input, shape index: {}]   ;;  %s1831_s4 = inlined_call_operand.vmem [shape: f32[128,128], index: 4, kind: input, shape index: {}]   ;;  %s1832_s5 = inlined_call_operand.vmem [shape: f32[2,16,24], index: 5, kind: input, shape index: {}]   ;;  %s1833_s6 = inlined_call_operand.hbm [shape: f32[9,128], index: 6, kind: input, shape index: {}]   ;;  %s1834_s7 = inlined_call_operand.vmem [shape: f32[24,144], index: 7, kind: input, shape index: {}]   ;;  %s1835_s8 = inlined_call_operand.vmem [shape: f32[24,1], index: 8, kind: input, shape index: {}]   ;;  %s1836_s9 = inlined_call_operand.hbm [shape: f32[128,128], index: 9, kind: input, shape index: {}]   ;;  %s1837_s10 = inlined_call_operand.hbm [shape: f32[2,16,24], index: 10, kind: input, shape index: {}]   ;;  %s1838_s11 = inlined_call_operand.hbm [shape: f32[16,128], index: 11, kind: input, shape index: {}]   ;;  %s1839_s12 = inlined_call_operand.vmem [shape: f32[2,16], index: 12, kind: input, shape index: {}]   ;;  %s1840_s13 = inlined_call_operand.vmem [shape: f32[2,1], index: 13, kind: input, shape index: {}]   ;;  %s1841_s14 = inlined_call_operand.vmem [shape: f32[2,2,1], index: 14, kind: output, shape index: {}]  }
   0x1   :  { %1843 = sst [smem:[#allocation14_spill]] %s1829_s2 }
   0x2   :  { %1844 = sst [smem:[#allocation15_spill]] %s1833_s6 }
   0x3   :  { %1845 = sst [smem:[#allocation16_spill]] %s1837_s10 }
   0x4   :  { %19 = vsyncpa [#allocation3], 0 }
   0x5   :  { %20 = vsyncpa [#allocation5], 0 }
   0x6   :  { %21 = vsyncpa [#allocation8], 0  ;;  %s1598_s29 = smov 0  }
   0x7 LB: > { %1846 = sst [smem:[#allocation13_spill]] %s1498_s29  ;;  %s1604_s30 = sadd.s32 4294967295, %s1498_s29   ;;  %s1498_s29 = sphi %s1598_s29, %s27_s29  }
   0x8   : > { %p1200_p0 = scmp.ge.s32.totalorder %s1498_s29, 1  ;;  %p357_p1 = scmp.lt.s32.totalorder %s1498_s29, 3 }
   0x9   : > { %p1272_p2 = scmp.eq.s32.totalorder %s1604_s30, 0  ;;  %s1847_s6 = sld [smem:[#allocation15_spill]] }
   0xa   : > { %p1612_p3 = pnand %p1200_p0, %p357_p1  ;;  %s1849_s10 = sld [smem:[#allocation16_spill]] }
   0xb   : > { %s1500_s22 = smov [#allocation4]   ;;  %s1501_s25 = smov [#allocation7]  }
   0xc   : > { %p1256_p4 = pneg %p1612_p3  ;;  %s396_s23 = sshll.u32 %s1500_s22, 4  ;;  %s397_s23 = int_to_ptr.vmem [resolvable:$true] %s396_s23 }
   0xd   : > { %s430_s26 = sshll.u32 %s1501_s25, 4  ;;  %s1851_s2 = sld [smem:[#allocation14_spill]]  ;;  %s431_s26 = int_to_ptr.vmem [resolvable:$true] %s430_s26 }
   0xe   : > { %p1623_p5 = pnand %p1272_p2, %p1256_p4  ;;  %s1502_s16 = smov 128  }
   0xf   : > { %s394_s17 = sshll.u32 %s1847_s6, 4  ;;  %s1503_s19 = smov 8   ;;  %s395_s17 = int_to_ptr.hbm [resolvable:$true] %s394_s17 }
  0x10   : > { %s428_s21 = sshll.u32 %s1849_s10, 4  ;;  %s1504_s20 = smov [#allocation2]   ;;  %s429_s21 = int_to_ptr.hbm [resolvable:$true] %s428_s21 }
  0x11   : > { %1262 = dma.hbm_to_vmem [thread:$0]  (!%p1623_p5), %s395_s17, 256, %s397_s23, [#allocation5], %s1502_s16, %s1502_s16, %s1503_s19  }
  0x12   : > { %1268 = dma.hbm_to_vmem [thread:$0]  (!%p1623_p5), %s429_s21, 512, %s431_s26, [#allocation8], %s1502_s16, %s1502_s16, %s1503_s19  }
  0x13   : > { %s371_s15 = sshll.u32 %s1851_s2, 4  ;;  %s373_s22 = sshll.u32 %s1504_s20, 4  ;;  %s372_s15 = int_to_ptr.hbm [resolvable:$true] %s371_s15  ;;  %s374_s22 = int_to_ptr.vmem [resolvable:$true] %s373_s22 }
  0x14   : > { %s414_s25 = sshll.u32 %s1836_s9, 4  ;;  %s442_s2 = sshll.u32 %s1838_s11, 4  ;;  %s415_s25 = int_to_ptr.hbm [resolvable:$true] %s414_s25  ;;  %s443_s2 = int_to_ptr.hbm [resolvable:$true] %s442_s2 }
  0x15   : > { %1259 = dma.hbm_to_vmem [thread:$0]  (!%p1623_p5), %s372_s15, 384, %s374_s22, [#allocation3], %s1502_s16, %s1502_s16, %s1503_s19  }
  0x16   : > { %s1505_s29 = smov [#allocation6]   ;;  %s1506_s21 = smov [#allocation9]  }
  0x17   : > { %s416_s17 = sshll.u32 %s1505_s29, 4  ;;  %s444_s23 = sshll.u32 %s1506_s21, 4  ;;  %s417_s17 = int_to_ptr.vmem [resolvable:$true] %s416_s17  ;;  %s445_s23 = int_to_ptr.vmem [resolvable:$true] %s444_s23 }
  0x18   : > { %1265 = dma.hbm_to_vmem [thread:$0]  (!%p1623_p5), %s415_s25, 2048, %s417_s17, [#allocation5], %s1502_s16, %s1502_s16, %s1503_s19  }
  0x19   : > { %1271 = dma.hbm_to_vmem [thread:$0]  (!%p1623_p5), %s443_s2, 256, %s445_s23, [#allocation8], %s1502_s16, %s1502_s16, %s1503_s19  }
  0x1a   : > { %473 = sbr.rel (%p1612_p3) target bundleno = 1953 (0x7a1), region = 76 }
  0x1f   : > { %1485 = dma.done.wait (%p1272_p2), [#allocation3], 384  }
  0x20   : > { %1487 = vsyncadd (%p1272_p2), [#allocation3], 4294966912 }
  0x21   : > { %1489 = dma.done.wait (%p1272_p2), [#allocation5], 2304  }
  0x22   : > { %1491 = vsyncadd (%p1272_p2), [#allocation5], 4294964992 }
  0x23   : > { %1493 = dma.done.wait (%p1272_p2), [#allocation8], 768  }
  0x24   : > { %1495 = vsyncadd (%p1272_p2), [#allocation8], 4294966528  ;;  %p538_p6 = scmp.lt.s32.totalorder %s1604_s30, 1  ;;  %s1507_s18 = smov 119   ;;  %v1316_v1 = vld [vmem:[%s1828_s1 + $0x8] ss:$0 sm:$0xff] }
  0x25   : > { %s1508_s24 = smov 121   ;;  %s1509_s26 = smov 1   ;;  %v547_v5 = vld [vmem:[%s1828_s1] sm:$0xff]  ;;  %v587_v14 = vld [vmem:[%s1830_s3 + $0x8] sm:$0xff]  ;;  %v588_v15 = vld [vmem:[%s1830_s3 + $0x10] sm:$0xff]  ;;  %v1515_v18 = vmov 0  }
  0x26   : > { %s1854_s30 = smov (!%p538_p6, %s1604_s30), 1  ;;  %s1510_s15 = smov 120   ;;  %v577_v7 = vperm.slane %v547_v5, 7  ;;  %v573_v8 = vperm.slane %v547_v5, 6  ;;  %v569_v9 = vperm.slane %v547_v5, 5  ;;  %v565_v13 = vperm.slane %v547_v5, 4  ;;  %1314 = vset.pattern.permute.xlu0 %v1515_v18  ;;  %1315 = vset.pattern.permute.xlu1 %v1515_v18 }
  0x27   : > { %s1213_s2 = sshll.u32 %s1854_s30, 3  ;;  %s1511_s16 = smov 127   ;;  %v586_v19 = vld [vmem:[%s1830_s3] sm:$0xff]  ;;  %v563_v20 = vperm.slane %v547_v5, 3  ;;  %v559_v22 = vperm.slane %v547_v5, 2  ;;  %1313 = vset.pattern.permute.xlu2 %v1515_v18  ;;  %v555_v24 = vperm.slane %v547_v5, 1 }
  0x28   : > { %s541_s29 = scalar_lea.vmem %s1827_s0, %s1213_s2  ;;  %s1512_s19 = smov 7   ;;  %v551_v28 = vperm.slane %v547_v5, 0  ;;  %v583_v32 = vld [vmem:[#allocation2] sm:$0xff]  ;;  %vm604_vm0 = vcmask 588800   ;;  %v584_v33 = vld [vmem:[#allocation2 + $0x8] sm:$0xff]  ;;  %v585_v34 = vld [vmem:[#allocation2 + $0x10] sm:$0xff] }
  0x29   : > { %v546_v0 = vld [vmem:[%s541_s29] sm:$0xff]  ;;  %s1513_s20 = smov 8   ;;  %s1514_s22 = smov 9   ;;  %v676_v49 = vld [vmem:[%s1831_s4 + $0x78] sm:$0xff]  ;;  %v675_v50 = vld [vmem:[%s1831_s4 + $0x70] sm:$0xff]  ;;  %vm705_vm1 = vcmask 195584  }
  0x2a   : > { %579 = vrot.lane.b32.xlu0 %v546_v0, %s1507_s18  ;;  %571 = vrot.lane.b32.xlu1 %v546_v0, %s1508_s24  ;;  %v566_v21 = vmul.f32 %v565_v13, %v546_v0  ;;  %v674_v51 = vld [vmem:[%s1831_s4 + $0x68] sm:$0xff]  ;;  %v673_v52 = vld [vmem:[%s1831_s4 + $0x60] sm:$0xff]  ;;  %s1516_s21 = smov 124   ;;  %s1517_s23 = smov 125   ;;  %vm854_vm2 = vcmask 130048   ;;  %vm1093_vm3 = vcmask 1024  }
  0x2b   : > { %561 = vrot.lane.b32.xlu2 %v546_v0, %s1509_s26  ;;  %677 = vmatpush.msra.mxu1 %v676_v49  ;;  %v672_v53 = vld [vmem:[%s1831_s4 + $0x58] sm:$0xff]  ;;  %v671_v54 = vld [vmem:[%s1831_s4 + $0x50] sm:$0xff]  ;;  %v670_v55 = vld [vmem:[%s1831_s4 + $0x48] sm:$0xff]  ;;  %s1518_s2 = smov 4   ;;  %s1519_s6 = smov 3  }
  0x2c   : > { %v669_v56 = vld [vmem:[%s1831_s4 + $0x40] sm:$0xff]  ;;  %v668_v59 = vld [vmem:[%s1831_s4 + $0x38] sm:$0xff]  ;;  %v667_v60 = vld [vmem:[%s1831_s4 + $0x30] sm:$0xff]  ;;  %s1520_s10 = smov 5   ;;  %s1521_s18 = smov 123  }
  0x2d   : > { %678 = vmatpush.msra.mxu1 %v675_v50  ;;  %v666_v61 = vld [vmem:[%s1831_s4 + $0x28] sm:$0xff]  ;;  %s1214_s24 = sshll.u32 %s1854_s30, 1 }
  0x2e   : > { %s545_s25 = scalar_lea.vmem %s1841_s14, %s1214_s24 }
  0x2f   : > { %679 = vmatpush.msra.mxu1 %v674_v51 }
  0x31   : > { %680 = vmatpush.msra.mxu1 %v673_v52 }
  0x32   : > { %575 = vrot.lane.b32.xlu0 %v546_v0, %s1510_s15  ;;  %567 = vrot.lane.b32.xlu1 %v546_v0, %s1511_s16 }
  0x33   : > { %557 = vrot.lane.b32.xlu2 %v546_v0, %s1512_s19  ;;  %681 = vmatpush.msra.mxu1 %v672_v53 }
  0x35   : > { %682 = vmatpush.msra.mxu1 %v671_v54 }
  0x37   : > { %683 = vmatpush.msra.mxu1 %v670_v55 }
  0x39   : > { %684 = vmatpush.msra.mxu1 %v669_v56 }
  0x3a   : > { %553 = vrot.lane.b32.xlu0 %v546_v0, %s1513_s20  ;;  %549 = vrot.lane.b32.xlu1 %v546_v0, %s1514_s22  ;;  %v665_v0 = vld [vmem:[%s1831_s4 + $0x20] sm:$0xff] }
  0x3b   : > { %591 = vperm.xlu2 %1313, %v586_v19   ;;  %685 = vmatpush.msra.mxu1 %v668_v59 }
  0x3d   : > { %686 = vmatpush.msra.mxu1 %v667_v60 }
  0x3f   : > { %687 = vmatpush.msra.mxu1 %v666_v61 }
  0x41   : > { %688 = vmatpush.msra.mxu1 %v665_v0 }
  0x42   : > { %596 = vperm.xlu0 %1314, %v587_v14   ;;  %601 = vperm.xlu1 %1315, %v588_v15   ;;  %v703_v14 = vld [vmem:[%s1832_s5] sm:$0xff]  ;;  %v1220_v15 = vld [vmem:[%s1832_s5 + $0x10] sm:$0xff] }
  0x85   : > { %v562_v6 = vpop.permute.xlu2 %561 }
  0x86   : > { %v564_v26 = vmul.f32 %v563_v20, %v562_v6 }
  0x8d   : > { %v558_v23 = vpop.permute.xlu2 %557 }
  0x8e   : > { %v560_v27 = vmul.f32 %v559_v22, %v558_v23 }
  0x95   : > { %v592_v35 = vpop.permute.xlu2 %591 }
  0x9c   : > { %v580_v2 = vpop.permute.xlu0 %579  ;;  %v572_v3 = vpop.permute.xlu1 %571 }
  0x9d   : > { %v582_v4 = vmul.f32 %v1316_v1, %v580_v2  ;;  %v574_v16 = vmul.f32 %v573_v8, %v572_v3  ;;  %v664_v1 = vld [vmem:[%s1831_s4 + $0x18] sm:$0xff]  ;;  %v663_v2 = vld [vmem:[%s1831_s4 + $0x10] sm:$0xff]  ;;  %v662_v3 = vld [vmem:[%s1831_s4 + $0x8] sm:$0xff] }
  0x9e   : > { %689 = vmatpush.msra.mxu1 %v664_v1 }
  0x9f   : > { %621 = vmatpush.msra.mxu0 %v582_v4  ;;  %v661_v4 = vld [vmem:[%s1831_s4] sm:$0xff] }
  0xa0   : > { %690 = vmatpush.msra.mxu1 %v663_v2 }
  0xa2   : > { %691 = vmatpush.msra.mxu1 %v662_v3 }
  0xa4   : > { %v576_v10 = vpop.permute.xlu0 %575  ;;  %v568_v11 = vpop.permute.xlu1 %567  ;;  %692 = vmatpush.msra.mxu1 %v661_v4 }
  0xa5   : > { %v578_v12 = vmul.f32 %v577_v7, %v576_v10  ;;  %v570_v17 = vmul.f32 %v569_v9, %v568_v11 }
  0xa7   : > { %622 = vmatpush.msra.mxu0 %v578_v12 }
  0xa9   : > { %623 = vmatpush.msra.mxu0 %v574_v16  ;;  %v704_v16 = vld [vmem:[%s1832_s5 + $0x8] sm:$0xff] }
  0xab   : > { %624 = vmatpush.msra.mxu0 %v570_v17  ;;  %v1221_v17 = vld [vmem:[%s1832_s5 + $0x18] sm:$0xff] }
  0xac   : > { %v554_v25 = vpop.permute.xlu0 %553  ;;  %v550_v29 = vpop.permute.xlu1 %549 }
  0xad   : > { %625 = vmatpush.msra.mxu0 %v566_v21  ;;  %v556_v30 = vmul.f32 %v555_v24, %v554_v25  ;;  %v552_v31 = vmul.f32 %v551_v28, %v550_v29  ;;  %v836_v24 = vld [vmem:[%s1835_s8] sm:$0xff]  ;;  %v837_v25 = vld [vmem:[%s1835_s8 + $0x8] sm:$0xff] }
  0xaf   : > { %626 = vmatpush.msra.mxu0 %v564_v26  ;;  %v838_v26 = vld [vmem:[%s1835_s8 + $0x10] sm:$0xff] }
  0xb1   : > { %627 = vmatpush.msra.mxu0 %v560_v27 }
  0xb3   : > { %628 = vmatpush.msra.mxu0 %v556_v30 }
  0xb4   : > { %v597_v38 = vpop.permute.xlu0 %596  ;;  %v602_v42 = vpop.permute.xlu1 %601 }
  0xb5   : > { %629 = vmatpush.msra.mxu0 %v552_v31  ;;  %v769_v31 = vld [vmem:[#allocation4] sm:$0xff] }
  0xb6   : > { %1215 = vmatmul.msk.f32.vlgmr.msra.gmra.mxu0 %vm604_vm0, %v583_v32  ;;  %v820_v32 = vperm.slane %v769_v31, 7  ;;  %v799_v49 = vperm.slane %v769_v31, 4  ;;  %v796_v52 = vperm.slane %v769_v31, 3  ;;  %v789_v54 = vperm.slane %v769_v31, 2 }
  0xb7   : > { %v782_v60 = vperm.slane %v769_v31, 1  ;;  %v775_v0 = vperm.slane %v769_v31, 0 }
  0xbe   : > { %1216 = vmatmul.msk.f32.gmra.mxu0 %vm604_vm0, %v584_v33 }
  0xc6   : > { %1217 = vmatmul.msk.f32.gmra.mxu0 %vm604_vm0, %v585_v34 }
 0x133   : > { %v631_v36 = vpop.f32.mrf.mxu0 }
 0x134   : > { %v632_v37 = vadd.f32 %v631_v36, %v592_v35  ;;  %v813_v35 = vperm.slane %v769_v31, 6 }
 0x136   : > { %1318 = vtanh.f32 %v632_v37 }
 0x13b   : > { %v634_v39 = vpop.f32.mrf.mxu0 }
 0x13c   : > { %v1319_v40 = vpop.eup %1318  ;;  %v635_v41 = vadd.f32 %v634_v39, %v597_v38  ;;  %v1317_v39 = vld [vmem:[#allocation4 + $0x8] ss:$0 sm:$0xff] }
 0x13d   : > { %643 = vrot.lane.b32.xlu2 %v1319_v40, %s1511_s16 }
 0x13e   : > { %1320 = vtanh.f32 %v635_v41 }
 0x143   : > { %v637_v43 = vpop.f32.mrf.mxu0 }
 0x144   : > { %v1321_v44 = vpop.eup %1320  ;;  %v638_v45 = vadd.f32 %v637_v43, %v602_v42 }
 0x145   : > { %645 = vrot.lane.b32.xlu1 %v1321_v44, %s1511_s16 }
 0x146   : > { %1322 = vtanh.f32 %v638_v45 }
 0x14c   : > { %v1323_v46 = vpop.eup %1322 }
 0x14d   : > { %647 = vrot.lane.b32.xlu2 %v1323_v46, %s1511_s16 }
 0x197   : > { %v644_v47 = vpop.permute.xlu2 %643 }
 0x198   : > { %v649_v48 = vmax.f32 %v1319_v40, %v644_v47 }
 0x19a   : > { %652 = vrot.lane.b32.xlu0 %v649_v48, %s1510_s15 }
 0x1a7   : > { %v648_v57 = vpop.permute.xlu2 %647 }
 0x1a8   : > { %v651_v58 = vmax.f32 %v1323_v46, %v648_v57 }
 0x1aa   : > { %656 = vrot.lane.b32.xlu2 %v651_v58, %s1510_s15 }
 0x1b7   : > { %v646_v62 = vpop.permute.xlu1 %645 }
 0x1b8   : > { %v650_v63 = vmax.f32 %v1321_v44, %v646_v62  ;;  %v806_v44 = vperm.slane %v769_v31, 5 }
 0x1ba   : > { %654 = vrot.lane.b32.xlu1 %v650_v63, %s1510_s15 }
 0x204   : > { %v657_v9 = vpop.permute.xlu2 %656 }
 0x205   : > { %v660_v10 = vmax.f32 %v651_v58, %v657_v9  ;;  %v832_v9 = vld [vmem:[%s1834_s7 + $0x10] sm:$0xff] }
 0x20c   : > { %v653_v5 = vpop.permute.xlu0 %652 }
 0x20d   : > { %v658_v6 = vmax.f32 %v649_v48, %v653_v5  ;;  %v830_v5 = vld [vmem:[%s1834_s7] sm:$0xff] }
 0x20f   : > { %693 = vmatmul.f32.vlgmr.msra.gmra.mxu1 %v658_v6 }
 0x22c   : > { %v655_v7 = vpop.permute.xlu1 %654 }
 0x22d   : > { %v659_v8 = vmax.f32 %v650_v63, %v655_v7 }
 0x22f   : > { %696 = vmatmul.f32.gmra.mxu1 %v659_v8  ;;  %v833_v8 = vld [vmem:[%s1834_s7 + $0x18] sm:$0xff] }
 0x237   : > { %699 = vmatmul.f32.gmra.mxu1 %v660_v10  ;;  %v835_v10 = vld [vmem:[%s1834_s7 + $0x28] sm:$0xff] }
 0x28c   : > { %v694_v11 = vpop.f32.mrf.mxu1 }
 0x2ac   : > { %v697_v12 = vpop.f32.mrf.mxu1 }
 0x2b4   : > { %v700_v13 = vpop.f32.mrf.mxu1 }
 0x2b5   : > { %725 = vmatpush.msra.mxu2 %v700_v13  ;;  %757 = vmatpush.msra.mxu3 %v700_v13 }
 0x2b7   : > { %726 = vmatpush.msra.mxu2 %v697_v12  ;;  %758 = vmatpush.msra.mxu3 %v697_v12  ;;  %v831_v12 = vld [vmem:[%s1834_s7 + $0x8] sm:$0xff] }
 0x2b9   : > { %727 = vmatpush.msra.mxu2 %v694_v11  ;;  %759 = vmatpush.msra.mxu3 %v694_v11  ;;  %v834_v11 = vld [vmem:[%s1834_s7 + $0x20] sm:$0xff] }
 0x2ba   : > { %1218 = vmatmul.msk.f32.vlgmr.msra.gmra.mxu2 %vm705_vm1, %v703_v14  ;;  %1222 = vmatmul.msk.f32.vlgmr.msra.gmra.mxu3 %vm705_vm1, %v1220_v15 }
 0x2c2   : > { %1219 = vmatmul.msk.f32.gmra.mxu2 %vm705_vm1, %v704_v16  ;;  %1223 = vmatmul.msk.f32.gmra.mxu3 %vm705_vm1, %v1221_v17 }
 0x33d   : > { %v729_v18 = vpop.f32.mrf.mxu2  ;;  %v761_v19 = vpop.f32.mrf.mxu3 }
 0x33e   : > { %v1756_v20 = vmax.f32 %v729_v18, %v761_v19 }
 0x340   : > { %816 = vrot.lane.b32.xlu1 %v1756_v20, %s1516_s21  ;;  %v800_v53 = vmul.f32 %v799_v49, %v1756_v20 }
 0x345   : > { %v732_v21 = vpop.f32.mrf.mxu2  ;;  %v764_v22 = vpop.f32.mrf.mxu3 }
 0x346   : > { %v768_v23 = vmax.f32 %v732_v21, %v764_v22 }
 0x348   : > { %804 = vrot.lane.b32.xlu1 %v768_v23, %s1511_s16  ;;  %811 = vrot.lane.b32.xlu2 %v768_v23, %s1517_s23  ;;  %v801_v50 = vmul.f32 %v799_v49, %v768_v23  ;;  %v940_v49 = vld [vmem:[#allocation6 + $0x18] sm:$0xff] }
 0x349   : > { %818 = vrot.lane.b32.xlu0 %v768_v23, %s1516_s21 }
 0x350   : > { %792 = vrot.lane.b32.xlu1 %v1756_v20, %s1509_s26  ;;  %802 = vrot.lane.b32.xlu2 %v1756_v20, %s1511_s16 }
 0x351   : > { %809 = vrot.lane.b32.xlu0 %v1756_v20, %s1517_s23 }
 0x358   : > { %780 = vrot.lane.b32.xlu1 %v768_v23, %s1518_s2  ;;  %787 = vrot.lane.b32.xlu2 %v768_v23, %s1519_s6 }
 0x359   : > { %794 = vrot.lane.b32.xlu0 %v768_v23, %s1509_s26 }
 0x360   : > { %771 = vrot.lane.b32.xlu1 %v1756_v20, %s1520_s10  ;;  %778 = vrot.lane.b32.xlu2 %v1756_v20, %s1518_s2 }
 0x361   : > { %785 = vrot.lane.b32.xlu0 %v1756_v20, %s1519_s6 }
 0x368   : > { %841 = vperm.xlu1 %1315, %v836_v24   ;;  %825 = vrot.lane.b32.xlu2 %v768_v23, %s1521_s18 }
 0x369   : > { %773 = vrot.lane.b32.xlu0 %v768_v23, %s1520_s10 }
 0x370   : > { %846 = vperm.xlu2 %1313, %v837_v25  }
 0x371   : > { %823 = vrot.lane.b32.xlu0 %v1756_v20, %s1521_s18 }
 0x379   : > { %851 = vperm.xlu0 %1314, %v838_v26  }
 0x3a2   : > { %v812_v27 = vpop.permute.xlu2 %811 }
 0x3a3   : > { %v815_v40 = vmul.f32 %v813_v35, %v812_v27 }
 0x3aa   : > { %v803_v28 = vpop.permute.xlu2 %802 }
 0x3ab   : > { %v807_v48 = vmul.f32 %v806_v44, %v803_v28 }
 0x3b2   : > { %v788_v29 = vpop.permute.xlu2 %787  ;;  %v817_v30 = vpop.permute.xlu1 %816 }
 0x3b3   : > { %v821_v38 = vmul.f32 %v820_v32, %v817_v30  ;;  %v791_v58 = vmul.f32 %v789_v54, %v788_v29 }
 0x3ba   : > { %v779_v33 = vpop.permute.xlu2 %778  ;;  %v805_v37 = vpop.permute.xlu1 %804 }
 0x3bb   : > { %v819_v34 = vpop.permute.xlu0 %818  ;;  %v808_v46 = vmul.f32 %v806_v44, %v805_v37  ;;  %v783_v63 = vmul.f32 %v782_v60, %v779_v33  ;;  %v952_v37 = vld [vmem:[#allocation6 + $0x78] sm:$0xff]  ;;  %v945_v44 = vld [vmem:[#allocation6 + $0x40] sm:$0xff] }
 0x3bc   : > { %v822_v36 = vmul.f32 %v820_v32, %v819_v34  ;;  %953 = vmatpush.msrb.mxu0 %v952_v37 }
 0x3be   : > { %864 = vmatpush.msrb.mxu2 %v822_v36 }
 0x3c0   : > { %865 = vmatpush.msrb.mxu2 %v821_v38  ;;  %v951_v38 = vld [vmem:[#allocation6 + $0x70] sm:$0xff] }
 0x3c1   : > { %954 = vmatpush.msrb.mxu0 %v951_v38 }
 0x3c2   : > { %866 = vmatpush.msrb.mxu2 %v815_v40  ;;  %v826_v41 = vpop.permute.xlu2 %825  ;;  %v793_v47 = vpop.permute.xlu1 %792  ;;  %v949_v40 = vld [vmem:[#allocation6 + $0x60] sm:$0xff] }
 0x3c3   : > { %v829_v42 = vmul.f32 %v1317_v39, %v826_v41  ;;  %v810_v43 = vpop.permute.xlu0 %809  ;;  %v797_v56 = vmul.f32 %v796_v52, %v793_v47  ;;  %v948_v41 = vld [vmem:[#allocation6 + $0x58] sm:$0xff]  ;;  %v942_v47 = vld [vmem:[#allocation6 + $0x28] sm:$0xff] }
 0x3c4   : > { %v814_v45 = vmul.f32 %v813_v35, %v810_v43  ;;  %v946_v43 = vld [vmem:[#allocation6 + $0x48] sm:$0xff] }
 0x3c5   : > { %1234 = vmatpush.msrb.mxu3 %v829_v42 }
 0x3c6   : > { %867 = vmatpush.msrb.mxu2 %v814_v45  ;;  %v944_v45 = vld [vmem:[#allocation6 + $0x38] sm:$0xff] }
 0x3c8   : > { %868 = vmatpush.msrb.mxu2 %v808_v46  ;;  %v943_v46 = vld [vmem:[#allocation6 + $0x30] sm:$0xff] }
 0x3ca   : > { %869 = vmatpush.msrb.mxu2 %v807_v48  ;;  %v781_v57 = vpop.permute.xlu1 %780  ;;  %v847_v15 = vpop.permute.xlu2 %846  ;;  %v941_v48 = vld [vmem:[#allocation6 + $0x20] sm:$0xff] }
 0x3cb   : > { %v795_v51 = vpop.permute.xlu0 %794  ;;  %v784_v62 = vmul.f32 %v782_v60, %v781_v57 }
 0x3cc   : > { %870 = vmatpush.msrb.mxu2 %v801_v50  ;;  %v798_v55 = vmul.f32 %v796_v52, %v795_v51  ;;  %v939_v50 = vld [vmem:[#allocation6 + $0x10] sm:$0xff]  ;;  %v938_v51 = vld [vmem:[#allocation6 + $0x8] sm:$0xff]  ;;  %v937_v52 = vld [vmem:[#allocation6] sm:$0xff] }
 0x3ce   : > { %871 = vmatpush.msrb.mxu2 %v800_v53 }
 0x3d0   : > { %872 = vmatpush.msrb.mxu2 %v798_v55 }
 0x3d2   : > { %873 = vmatpush.msrb.mxu2 %v797_v56  ;;  %v772_v1 = vpop.permute.xlu1 %771 }
 0x3d3   : > { %v786_v59 = vpop.permute.xlu0 %785  ;;  %v776_v4 = vmul.f32 %v775_v0, %v772_v1  ;;  %v1012_v1 = vld [vmem:[#allocation7 + $0x18] sm:$0xff] }
 0x3d4   : > { %v790_v61 = vmul.f32 %v789_v54, %v786_v59  ;;  %874 = vmatpush.msrb.mxu2 %v791_v58 }
 0x3d6   : > { %875 = vmatpush.msrb.mxu2 %v790_v61 }
 0x3d8   : > { %876 = vmatpush.msrb.mxu2 %v784_v62  ;;  %v979_v62 = vld [vmem:[#allocation7] sm:$0xff] }
 0x3da   : > { %877 = vmatpush.msrb.mxu2 %v783_v63  ;;  %v842_v25 = vpop.permute.xlu1 %841  ;;  %v1011_v63 = vld [vmem:[#allocation7 + $0x10] sm:$0xff] }
 0x3db   : > { %v774_v2 = vpop.permute.xlu0 %773 }
 0x3dc   : > { %v777_v3 = vmul.f32 %v775_v0, %v774_v2  ;;  %v980_v0 = vld [vmem:[#allocation7 + $0x8] sm:$0xff]  ;;  %v1522_v2 = vmov 1.0  }
 0x3de   : > { %878 = vmatpush.msrb.mxu2 %v777_v3 }
 0x3e0   : > { %879 = vmatpush.msrb.mxu2 %v776_v4 }
 0x3e1   : > { %880 = vmatmul.f32.vlgmr.msrb.gmra.mxu2 %v830_v5 }
 0x3e2   : > { %904 = vmatpush.msra.mxu2 %v829_v42  ;;  %v947_v42 = vld [vmem:[#allocation6 + $0x50] sm:$0xff] }
 0x3e3   : > { %v824_v6 = vpop.permute.xlu0 %823 }
 0x3e4   : > { %v828_v7 = vmul.f32 %v1317_v39, %v824_v6  ;;  %v950_v39 = vld [vmem:[#allocation6 + $0x68] sm:$0xff] }
 0x3e5   : > { %955 = vmatpush.msrb.mxu0 %v950_v39 }
 0x3e6   : > { %905 = vmatpush.msra.mxu2 %v828_v7  ;;  %1235 = vmatpush.msrb.mxu3 %v828_v7  ;;  %v1045_v7 = vld [vmem:[#allocation9 + $0x8] sm:$0xff] }
 0x3e7   : > { %1225 = vmatmul.msk.f32.vlgmr.msrb.gmra.mxu3 %vm854_vm2, %v833_v8  ;;  %956 = vmatpush.msrb.mxu0 %v949_v40 }
 0x3e9   : > { %883 = vmatmul.f32.gmra.mxu2 %v832_v9  ;;  %957 = vmatpush.msrb.mxu0 %v948_v41 }
 0x3eb   : > { %v852_v19 = vpop.permute.xlu0 %851  ;;  %958 = vmatpush.msrb.mxu0 %v947_v42 }
 0x3ed   : > { %959 = vmatpush.msrb.mxu0 %v946_v43 }
 0x3ef   : > { %1226 = vmatmul.msk.f32.gmra.mxu3 %vm854_vm2, %v835_v10  ;;  %960 = vmatpush.msrb.mxu0 %v945_v44  ;;  %v1044_v10 = vld [vmem:[#allocation9] sm:$0xff] }
 0x3f1   : > { %886 = vmatmul.f32.gmra.mxu2 %v834_v11  ;;  %961 = vmatpush.msrb.mxu0 %v944_v45 }
 0x3f3   : > { %962 = vmatpush.msrb.mxu0 %v943_v46 }
 0x3f5   : > { %963 = vmatpush.msrb.mxu0 %v942_v47 }
 0x3f7   : > { %964 = vmatpush.msrb.mxu0 %v941_v48 }
 0x3f9   : > { %1224 = vmatmul.msk.f32.vlgmr.msra.gmra.mxu2 %vm854_vm2, %v831_v12  ;;  %965 = vmatpush.msrb.mxu0 %v940_v49 }
 0x3fb   : > { %966 = vmatpush.msrb.mxu0 %v939_v50 }
 0x3fd   : > { %967 = vmatpush.msrb.mxu0 %v938_v51 }
 0x3ff   : > { %968 = vmatpush.msrb.mxu0 %v937_v52 }
 0x464   : > { %v881_v13 = vpop.f32.mrf.mxu2 }
 0x465   : > { %v882_v26 = vadd.f32 %v881_v13, %v842_v25  ;;  %v1048_v13 = vld [vmem:[%s1839_s12] sm:$0x3] }
 0x46a   : > { %v910_v14 = vpop.f32.mrf.mxu3 }
 0x46c   : > { %v884_v16 = vpop.f32.mrf.mxu2 }
 0x46d   : > { %v885_v17 = vadd.f32 %v884_v16, %v847_v15  ;;  %v1072_v15 = vld [vmem:[%s1840_s13] sm:$0x3] }
 0x46f   : > { %v911_v18 = vadd.f32 %v910_v14, %v885_v17 }
 0x471   : > { %1324 = vtanh.f32 %v911_v18 }
 0x472   : > { %v913_v21 = vpop.f32.mrf.mxu3 }
 0x474   : > { %v887_v20 = vpop.f32.mrf.mxu2 }
 0x475   : > { %v888_v22 = vadd.f32 %v887_v20, %v852_v19 }
 0x477   : > { %v1325_v23 = vpop.eup %1324  ;;  %v914_v24 = vadd.f32 %v913_v21, %v888_v22 }
 0x478   : > { %921 = vrot.lane.b32.xlu2 %v1325_v23, %s1511_s16 }
 0x479   : > { %1326 = vtanh.f32 %v914_v24 }
 0x47c   : > { %v907_v27 = vpop.f32.mrf.mxu2 }
 0x47d   : > { %v908_v28 = vadd.f32 %v907_v27, %v882_v26 }
 0x47f   : > { %v1327_v29 = vpop.eup %1326  ;;  %1328 = vtanh.f32 %v908_v28 }
 0x480   : > { %923 = vrot.lane.b32.xlu0 %v1327_v29, %s1511_s16 }
 0x485   : > { %v1329_v30 = vpop.eup %1328 }
 0x486   : > { %919 = vrot.lane.b32.xlu1 %v1329_v30, %s1511_s16 }
 0x4d2   : > { %v922_v31 = vpop.permute.xlu2 %921 }
 0x4d3   : > { %v926_v32 = vmax.f32 %v1325_v23, %v922_v31 }
 0x4d5   : > { %930 = vrot.lane.b32.xlu2 %v926_v32, %s1516_s21 }
 0x4f2   : > { %v924_v33 = vpop.permute.xlu0 %923 }
 0x4f3   : > { %v927_v34 = vmax.f32 %v1327_v29, %v924_v33 }
 0x4f5   : > { %932 = vrot.lane.b32.xlu0 %v927_v34, %s1516_s21 }
 0x4f8   : > { %v920_v35 = vpop.permute.xlu1 %919 }
 0x4f9   : > { %v925_v36 = vmax.f32 %v1329_v30, %v920_v35 }
 0x4fb   : > { %928 = vrot.lane.b32.xlu1 %v925_v36, %s1516_s21 }
 0x52f   : > { %v931_v55 = vpop.permute.xlu2 %930 }
 0x530   : > { %v935_v56 = vmax.f32 %v926_v32, %v931_v55 }
 0x567   : > { %v933_v57 = vpop.permute.xlu0 %932 }
 0x568   : > { %v936_v58 = vmax.f32 %v927_v34, %v933_v57 }
 0x56d   : > { %v929_v53 = vpop.permute.xlu1 %928 }
 0x56e   : > { %v934_v54 = vmax.f32 %v925_v36, %v929_v53 }
 0x570   : > { %969 = vmatmul.f32.vlgmr.msrb.gmra.mxu0 %v934_v54 }
 0x578   : > { %972 = vmatmul.f32.gmra.mxu0 %v935_v56 }
 0x580   : > { %975 = vmatmul.f32.gmra.mxu0 %v936_v58 }
 0x5ed   : > { %v970_v59 = vpop.f32.mrf.mxu0 }
 0x5f5   : > { %v973_v60 = vpop.f32.mrf.mxu0 }
 0x5fd   : > { %v976_v61 = vpop.f32.mrf.mxu0 }
 0x5fe   : > { %1000 = vmatpush.msra.mxu3 %v976_v61  ;;  %1032 = vmatpush.msrb.mxu1 %v976_v61 }
 0x600   : > { %1001 = vmatpush.msra.mxu3 %v973_v60  ;;  %1033 = vmatpush.msrb.mxu1 %v973_v60 }
 0x602   : > { %1002 = vmatpush.msra.mxu3 %v970_v59  ;;  %1034 = vmatpush.msrb.mxu1 %v970_v59 }
 0x603   : > { %1227 = vmatmul.msk.f32.vlgmr.msra.gmra.mxu3 %vm705_vm1, %v979_v62  ;;  %1229 = vmatmul.msk.f32.vlgmr.msrb.gmra.mxu1 %vm705_vm1, %v1011_v63 }
 0x604   : > { %1073 = vmatpush.msrb.mxu3 %v1522_v2 }
 0x606   : > { %1074 = vmatpush.msrb.mxu3 %v1522_v2 }
 0x608   : > { %1075 = vmatpush.msrb.mxu3 %v1522_v2 }
 0x60a   : > { %1076 = vmatpush.msrb.mxu3 %v1522_v2 }
 0x60b   : > { %1228 = vmatmul.msk.f32.gmra.mxu3 %vm705_vm1, %v980_v0  ;;  %1230 = vmatmul.msk.f32.gmra.mxu1 %vm705_vm1, %v1012_v1 }
 0x60c   : > { %1077 = vmatpush.msrb.mxu3 %v1522_v2 }
 0x60e   : > { %1078 = vmatpush.msrb.mxu3 %v1522_v2 }
 0x610   : > { %1079 = vmatpush.msrb.mxu3 %v1522_v2 }
 0x612   : > { %1080 = vmatpush.msrb.mxu3 %v1522_v2 }
 0x614   : > { %1081 = vmatpush.msrb.mxu3 %v1522_v2 }
 0x616   : > { %1082 = vmatpush.msrb.mxu3 %v1522_v2 }
 0x618   : > { %1083 = vmatpush.msrb.mxu3 %v1522_v2 }
 0x61a   : > { %1084 = vmatpush.msrb.mxu3 %v1522_v2 }
 0x61c   : > { %1085 = vmatpush.msrb.mxu3 %v1522_v2 }
 0x61e   : > { %1086 = vmatpush.msrb.mxu3 %v1522_v2 }
 0x620   : > { %1087 = vmatpush.msrb.mxu3 %v1522_v2 }
 0x622   : > { %1088 = vmatpush.msrb.mxu3 %v1522_v2 }
 0x680   : > { %v1036_v3 = vpop.f32.mrf.mxu1 }
 0x686   : > { %v1004_v4 = vpop.f32.mrf.mxu3 }
 0x687   : > { %v1042_v8 = vmax.f32 %v1004_v4, %v1036_v3 }
 0x688   : > { %v1039_v5 = vpop.f32.mrf.mxu1 }
 0x689   : > { %v1046_v12 = vmul.f32 %v1044_v10, %v1042_v8 }
 0x68e   : > { %v1007_v6 = vpop.f32.mrf.mxu3 }
 0x68f   : > { %v1043_v9 = vmax.f32 %v1007_v6, %v1039_v5 }
 0x691   : > { %v1047_v11 = vmul.f32 %v1045_v7, %v1043_v9 }
 0x693   : > { %1066 = vmatpush.msrb.mxu2 %v1047_v11 }
 0x695   : > { %1067 = vmatpush.msrb.mxu2 %v1046_v12 }
 0x696   : > { %1231 = vmatmul.msk.f32.vlgmr.msrb.gmra.mxu2 %vm854_vm2, %v1048_v13 }
 0x719   : > { %v1069_v14 = vpop.f32.mrf.mxu2 }
 0x71a   : > { %1089 = vmatmul.f32.vlgmr.msrb.gmra.mxu3 %v1069_v14 }
 0x79d   : > { %v1090_v16 = vpop.f32.mrf.mxu3 }
 0x79e   : > { %v1091_v17 = vadd.f32 %v1090_v16, %v1072_v15 }
 0x7a0   : > { %1094 = vst.msk [vmem:[%s545_s25] sm:$0x3] %vm1093_vm3, %v1091_v17 }
 0x7a1 PF: > { %s1852_s27 = sld [smem:[#allocation13_spill]] }
 0x7a7   : > { %s27_s29 = sadd.s32 1, %s1852_s27  }
 0x7a8   : > { %p24_p7 = scmp.ge.s32.totalorder %s27_s29, 4  }
 0x7aa   :  { %26 = sbr.rel (!%p24_p7) target bundleno = 7 (0x7), region = 129 }
 0x7af   :  { %1114 = vsyncpa [#allocation3], 1 }
 0x7b0   :  { %1116 = vsyncpa [#allocation3 + $0x1], 1 }
 0x7b1   :  { %1117 = vsyncpa [#allocation5], 1 }
 0x7b2   :  { %1118 = vsyncpa [#allocation8], 1 }

</bundles_post_ra>
